<compile_context>
chip_gen: v7x
topology: tpu7x:2x2x1
jax: 0.10.0
libtpu: 0.0.40
codegen_flags: <defaults>
</compile_context>

<pallas_src>
import functools

import jax
import jax.numpy as jnp
from jax import lax
from jax.experimental import pallas as pl
from jax.experimental.pallas import tpu as pltpu


def _gcn_combiner_kernel(positive_adj, tb, p,
                         scal_ref,            # SMEM (2,): [alpha1, bq_mean - bk_mean]
                         hs_ref,              # (TB, P, tT)  f32 / bf16
                         wp0_ref,             # (tT, J)      f32 / bf16
                         bp0_ref,             # (1, J)       f32
                         wq_ref,              # (P, 1)  conv_q1 weight, channel-mean column
                         wk_ref,              # (1, P)  conv_k1 weight, channel-mean row
                         adj_ref,             # (J, J)
                         wp1_ref,             # (J, 1)  param_pool1 weight
                         wg_ref,              # (P, Cp) (bn*conv1)^T @ wcls   (folded)
                         wb_ref,              # (1, Cp) (bn*conv1 bias)^T @ wcls
                         bcls_ref,            # (1, Cp) classifier bias (+ folded consts)
                         out_ref,             # (TB, Cp) f32
                         h1_acc,              # VMEM (TB*P, J) f32 accumulator
                         g_scr,               # VMEM (P, TB)   f32
                         vs_scr):             # VMEM (TB, 1)   f32
    kstep = pl.program_id(1)
    nsteps = pl.num_programs(1)

    @pl.when(kstep == 0)
    def _():
        h1_acc[...] = jnp.zeros_like(h1_acc)

    # param_pool0, chunked over T: the only matmul touching the large T axis.
    tt = hs_ref.shape[2]
    hs2 = hs_ref[...].reshape(tb * p, tt)
    h1_acc[...] += jnp.dot(hs2, wp0_ref[...], preferred_element_type=jnp.float32)

    @pl.when(kstep == nsteps - 1)
    def _():
        alpha = scal_ref[0]
        qk_bias = scal_ref[1]
        j = adj_ref.shape[0]

        h1 = h1_acc[...] + bp0_ref[...]                   # (TB*P, J) f32
        adj = adj_ref[...]
        wq = wq_ref[...]
        wk = wk_ref[...]
        wp1 = wp1_ref[...]
        ones_row = jnp.ones((1, j), jnp.float32)

        # Per-sample graph step.  After the reassociation
        #   ((bn*conv1)(h1) @ A1) @ wp1 == (bn*conv1)(h1 @ (A1 @ wp1)),
        # with conv1/BN/classifier folded into wg/wb in the wrapper, only the
        # tiny (J x J) attention core remains per sample.
        for s in range(tb):                               # static unroll
            h1s = h1[s * p:(s + 1) * p, :]                                    # (P, J)
            q_col = lax.dot_general(h1s, wq, (((0,), (0,)), ((), ())),
                                    preferred_element_type=jnp.float32)       # (J, 1)
            k_row = jnp.dot(wk, h1s, preferred_element_type=jnp.float32)      # (1, J)
            a1 = jnp.tanh(q_col - k_row + qk_bias)                            # (J, J)
            a1 = adj + a1 * alpha
            if positive_adj:   # corresponds to cfg.model.positive_adj == 'abs'
                a1 = jnp.abs(a1)
            v_col = jnp.dot(a1, wp1, preferred_element_type=jnp.float32)      # (J, 1)
            g_scr[:, s:s + 1] = jnp.dot(h1s, v_col,
                                        preferred_element_type=jnp.float32)   # (P, 1)
            vs_scr[s:s + 1, :] = jnp.dot(ones_row, v_col,
                                         preferred_element_type=jnp.float32)  # (1, 1)

        # Batched finalize: conv1 + BN + param_pool1 + dropout(eval) +
        # classifier collapse to one lane-dense (TB, Cp) matmul plus a rank-1
        # correction; written once as a single unmasked store.
        out = lax.dot_general(g_scr[...], wg_ref[...], (((0,), (0,)), ((), ())),
                              preferred_element_type=jnp.float32)             # (TB, Cp)
        out_ref[...] = out + vs_scr[...] * wb_ref[...] + bcls_ref[...]


def _round_down_mult(x, m):
    return (x // m) * m


def _fold_params(params, cp):
    """Exact (eval-mode) algebraic folds into the minimal kernel operand set."""
    P = params["wc1"].shape[0]
    C = params["wcls"].shape[1]
    wq_col = jnp.mean(params["wq"], axis=0).reshape(P, 1)       # conv_q1 + mean(1)
    wk_row = jnp.mean(params["wk"], axis=0).reshape(1, P)       # conv_k1 + mean(1)
    qk_bias = jnp.mean(params["bq"]) - jnp.mean(params["bk"])
    bn_scale = params["bn_scale"]                                # (P, 1)
    bn_shift = params["bn_shift"]                                # (P, 1)
    bn_w = bn_scale * params["wc1"]                              # BN folded into conv1
    bn_b = bn_scale * params["bc1"]
    wcls = params["wcls"]                                        # (P, C)
    wg = bn_w.T @ wcls                                           # conv1+BN absorbed into classifier
    wb = bn_b.T @ wcls                                           # rank-1 bias correction
    const_vec = bn_shift[:, 0] * jnp.sum(params["wp1"]) + params["bp1"][0, 0]
    bcls = params["bcls"] + const_vec @ wcls                     # BN-shift + bp1 folded
    pad = ((0, 0), (0, cp - C))
    scal = jnp.stack([params["alpha"].reshape(()), qk_bias]).astype(jnp.float32)
    return (wq_col.astype(jnp.float32), wk_row.astype(jnp.float32), scal,
            jnp.pad(wg, pad).astype(jnp.float32),
            jnp.pad(wb, pad).astype(jnp.float32),
            jnp.pad(bcls, pad).astype(jnp.float32))


def gcn_combiner_forward(hs, params, positive_adj=False, block_b=32,
                         block_t=None, use_bf16=True):
    """hs: (B, proj_size, total_num_selects) -> (B, num_classes)."""
    B, P, T = hs.shape
    J = params["wp0"].shape[1]
    C = params["wcls"].shape[1]
    Cp = ((C + 127) // 128) * 128            # lane-dense output slab (stripped below)

    itemsize = 2 if use_bf16 else 4
    hs_budget = 16 << 20                      # bytes for the double-buffered hs slab

    # Rows of the batch per grid step.  Multiples of 8 keep the (TB, Cp)
    # output block tile-aligned; for B >= 16 force >= 2 grid steps so both
    # v7x TensorCores get work (free on single-TC v5e/v6e).
    if B >= 16:
        tb = min(max(_round_down_mult(block_b, 8), 8),
                 max(_round_down_mult(B // 2, 8), 8))
        min_tt = 128 if T % 128 == 0 else T
        while tb > 8 and 2 * tb * P * min_tt * itemsize > hs_budget:
            tb -= 8
    else:
        tb = B
    nb = -(-B // tb)
    Bp = nb * tb

    # T chunk per grid step (reduction axis, kept last in the grid).
    if block_t is not None:
        tT = block_t
    elif T % 128 != 0:
        tT = T
    else:
        cands = [c for c in range(128, T + 1, 128) if T % c == 0]
        fits = [c for c in cands if 2 * tb * P * c * itemsize <= hs_budget]
        tT = max(fits) if fits else min(cands)
    assert T % tT == 0 and (tT % 128 == 0 or tT == T), (T, tT)
    nk = T // tT

    if Bp != B:
        hs = jnp.pad(hs, ((0, Bp - B), (0, 0), (0, 0)))

    wq_col, wk_row, scal, wg, wb, bcls = _fold_params(params, Cp)
    wp0, bp0 = params["wp0"], params["bp0"]
    adj, wp1 = params["adj"], params["wp1"]
    if use_bf16:
        # hs dominates HBM traffic; MXU accumulates in f32 and everything
        # after the param_pool0 matmul stays f32.
        hs = hs.astype(jnp.bfloat16)
        wp0 = wp0.astype(jnp.bfloat16)

    # Raise VMEM above the 16/32 MiB scoped defaults, stay inside the physical
    # capacity (64 MiB/TC on v7x, 128 MiB on v5e/v6e).
    try:
        vmem_cap = int(getattr(pltpu.get_tpu_info(), "vmem_capacity_bytes",
                               64 << 20))
    except Exception:
        vmem_cap = 64 << 20
    vmem_limit = int(max(32 << 20, min(vmem_cap * 3 // 4, 96 << 20)))

    cost = pl.CostEstimate(
        flops=2 * Bp * P * T * J + 2 * Bp * P * Cp + 6 * Bp * P * J + 4 * Bp * J * J,
        transcendentals=Bp * J * J,
        bytes_accessed=(Bp * P * T * itemsize + T * J * itemsize
                        + (2 * P * Cp + 2 * Cp + J * J + 2 * P + 2 * J) * 4
                        + Bp * Cp * 4))

    kernel = functools.partial(_gcn_combiner_kernel, positive_adj, tb, P)

    out = pl.pallas_call(
        kernel,
        out_shape=jax.ShapeDtypeStruct((Bp, Cp), jnp.float32),
        grid_spec=pltpu.PrefetchScalarGridSpec(
            num_scalar_prefetch=1,                       # scal -> SMEM
            grid=(nb, nk),                               # (batch, T-reduction)
            in_specs=[
                pl.BlockSpec((tb, P, tT), lambda b, k, s: (b, 0, k)),
                pl.BlockSpec((tT, J), lambda b, k, s: (k, 0)),
                pl.BlockSpec((1, J), lambda b, k, s: (0, 0)),
                pl.BlockSpec((P, 1), lambda b, k, s: (0, 0)),
                pl.BlockSpec((1, P), lambda b, k, s: (0, 0)),
                pl.BlockSpec((J, J), lambda b, k, s: (0, 0)),
                pl.BlockSpec((J, 1), lambda b, k, s: (0, 0)),
                pl.BlockSpec((P, Cp), lambda b, k, s: (0, 0)),
                pl.BlockSpec((1, Cp), lambda b, k, s: (0, 0)),
                pl.BlockSpec((1, Cp), lambda b, k, s: (0, 0)),
            ],
            out_specs=pl.BlockSpec((tb, Cp), lambda b, k, s: (b, 0)),
            scratch_shapes=[
                pltpu.VMEM((tb * P, J), jnp.float32),    # h1 accumulator
                pltpu.VMEM((P, tb), jnp.float32),        # g columns
                pltpu.VMEM((tb, 1), jnp.float32),        # per-sample sum(v)
            ],
        ),
        compiler_params=pltpu.CompilerParams(
            dimension_semantics=("parallel", "arbitrary"),
            vmem_limit_bytes=vmem_limit),
        cost_estimate=cost,
    )(scal, hs, wp0, bp0, wq_col, wk_row, adj, wp1, wg, wb, bcls)

    return out[:B, :C]


def gcn_combiner_ref(x_dict, params, positive_adj=False):
    """Pure-JAX reference mirroring the PyTorch forward (fpn_size path, eval mode)."""
    hs = jnp.concatenate([x_dict[name] for name in x_dict], axis=1)   # (B, T, P)
    hs = jnp.swapaxes(hs, 1, 2)                                       # (B, P, T)
    h1 = jnp.einsum("bpt,tj->bpj", hs, params["wp0"]) + params["bp0"]
    q = jnp.einsum("qp,bpj->bqj", params["wq"], h1) + params["bq"]
    k = jnp.einsum("qp,bpj->bqj", params["wk"], h1) + params["bk"]
    qm, km = q.mean(axis=1), k.mean(axis=1)                           # (B, J)
    a1 = jnp.tanh(qm[:, :, None] - km[:, None, :])
    a1 = params["adj"][None] + a1 * params["alpha"][0, 0]
    if positive_adj:
        a1 = jnp.abs(a1)
    h2 = jnp.einsum("op,bpj->boj", params["wc1"], h1) + params["bc1"]
    h3 = jnp.einsum("bpj,bjk->bpk", h2, a1)
    h4 = h3 * params["bn_scale"][None] + params["bn_shift"][None]
    h5 = jnp.einsum("bpj,jo->bpo", h4, params["wp1"]) + params["bp1"]
    h5 = h5.reshape(h5.shape[0], -1)                                  # (B, P)
    return h5 @ params["wcls"] + params["bcls"]


if __name__ == "__main__":
    # Small, consistent shapes: fpn_size == proj_size, total_num_selects % 32 == 0.
    B = 2
    proj_size = 32                 # fpn_size / proj_size
    total_num_selects = 256
    num_joints = total_num_selects // 32      # 8
    num_classes = 16
    P, T, J, C = proj_size, total_num_selects, num_joints, num_classes

    key = jax.random.PRNGKey(0)
    ks = jax.random.split(key, 20)

    # Input dict (fpn_size path: features used as-is), each (B, S, fpn_size).
    # TODO(synk): the fpn_size=None branch (per-input Linear-ReLU-Linear projection)
    # is not implemented; this kernel covers the fpn_size path of forward().
    x = {
        "layer1": jax.random.normal(ks[0], (B, T // 2, P), jnp.float32),
        "layer2": jax.random.normal(ks[1], (B, T // 2, P), jnp.float32),
    }

    # BatchNorm1d folded to per-channel scale/shift (inference mode).
    gamma = 1.0 + 0.1 * jax.random.normal(ks[10], (P,), jnp.float32)
    beta = 0.1 * jax.random.normal(ks[11], (P,), jnp.float32)
    running_mean = 0.1 * jax.random.normal(ks[12], (P,), jnp.float32)
    running_var = jnp.abs(1.0 + 0.1 * jax.random.normal(ks[13], (P,), jnp.float32))
    bn_scale = gamma / jnp.sqrt(running_var + 1e-5)
    bn_shift = beta - running_mean * bn_scale

    params = {
        "wp0": 0.05 * jax.random.normal(ks[2], (T, J), jnp.float32),   # Linear(T, J), pre-T
        "bp0": 0.05 * jax.random.normal(ks[3], (1, J), jnp.float32),
        "wq": 0.1 * jax.random.normal(ks[4], (P // 4, P), jnp.float32),  # Conv1d(P, P//4, 1)
        "bq": 0.1 * jax.random.normal(ks[5], (P // 4, 1), jnp.float32),
        "wk": 0.1 * jax.random.normal(ks[6], (P // 4, P), jnp.float32),
        "bk": 0.1 * jax.random.normal(ks[7], (P // 4, 1), jnp.float32),
        "adj": jnp.eye(J, dtype=jnp.float32) / 100.0 + 1.0 / 100.0,      # adj1 init
        "alpha": jnp.full((1, 1), 0.3, jnp.float32),  # learned scalar; nonzero so tanh matters
        "wc1": 0.1 * jax.random.normal(ks[8], (P, P), jnp.float32),      # Conv1d(P, P, 1)
        "bc1": 0.1 * jax.random.normal(ks[9], (P, 1), jnp.float32),
        "bn_scale": bn_scale.reshape(P, 1),
        "bn_shift": bn_shift.reshape(P, 1),
        "wp1": 0.1 * jax.random.normal(ks[14], (J, 1), jnp.float32),     # Linear(J, 1), pre-T
        "bp1": 0.1 * jax.random.normal(ks[15], (1, 1), jnp.float32),
        "wcls": 0.1 * jax.random.normal(ks[16], (P, C), jnp.float32),    # Linear(P, C), pre-T
        "bcls": 0.1 * jax.random.normal(ks[17], (1, C), jnp.float32),
    }

    # Glue: cat along dim=1 then transpose(1, 2), exactly as the PyTorch forward.
    hs_cat = jnp.swapaxes(jnp.concatenate([x["layer1"], x["layer2"]], axis=1), 1, 2)

    # TODO(synk): the original forward reads the global `cfg.model.positive_adj`
    # (not self.positive_adj); here it is a static Python flag (default off).
    # TODO(synk): dropout / BatchNorm are implemented in inference (eval) mode.
    ref = gcn_combiner_ref(x, params, positive_adj=False)

    # f32 path with the T axis split in two reduction steps (exercises the accumulator).
    out_f32 = jax.block_until_ready(
        gcn_combiner_forward(hs_cat, params, positive_adj=False,
                             use_bf16=False, block_t=128))
    assert out_f32.shape == (B, C), out_f32.shape
    assert jnp.allclose(out_f32, ref, atol=1e-4, rtol=1e-4), (
        f"f32 max abs err {jnp.max(jnp.abs(out_f32 - ref))}")

    # Default path: bf16 hs/wp0 with f32 accumulation (memory-bound => ~2x).
    out_bf16 = jax.block_until_ready(
        gcn_combiner_forward(hs_cat, params, positive_adj=False, block_t=128))
    assert out_bf16.shape == (B, C), out_bf16.shape
    assert jnp.allclose(out_bf16, ref, atol=2e-2, rtol=2e-2), (
        f"bf16 max abs err {jnp.max(jnp.abs(out_bf16 - ref))}")

    # positive_adj ('abs') branch, single T step (nk == 1 path).
    ref_abs = gcn_combiner_ref(x, params, positive_adj=True)
    out_abs = jax.block_until_ready(
        gcn_combiner_forward(hs_cat, params, positive_adj=True, use_bf16=False))
    assert jnp.allclose(out_abs, ref_abs, atol=1e-4, rtol=1e-4), (
        f"abs max abs err {jnp.max(jnp.abs(out_abs - ref_abs))}")

    print("KERNEL_OK")
</pallas_src>

<mosaic_0001>
module attributes {stable_mosaic.version = 11 : i64} {
  func.func @_gcn_combiner_kernel(%arg0: i32, %arg1: i32, %arg2: memref<2xf32, #tpu.memory_space<smem>>, %arg3: memref<2x32x128xf32, #tpu.memory_space<vmem>>, %arg4: memref<128x8xf32, #tpu.memory_space<vmem>>, %arg5: memref<1x8xf32, #tpu.memory_space<vmem>>, %arg6: memref<32x1xf32, #tpu.memory_space<vmem>>, %arg7: memref<1x32xf32, #tpu.memory_space<vmem>>, %arg8: memref<8x8xf32, #tpu.memory_space<vmem>>, %arg9: memref<8x1xf32, #tpu.memory_space<vmem>>, %arg10: memref<32x128xf32, #tpu.memory_space<vmem>>, %arg11: memref<1x128xf32, #tpu.memory_space<vmem>>, %arg12: memref<1x128xf32, #tpu.memory_space<vmem>>, %arg13: memref<2x128xf32, #tpu.memory_space<vmem>>, %arg14: memref<64x8xf32, #tpu.memory_space<vmem>>, %arg15: memref<32x2xf32, #tpu.memory_space<vmem>>, %arg16: memref<2x1xf32, #tpu.memory_space<vmem>>) attributes {dimension_semantics = [#tpu.dimension_semantics<parallel>, #tpu.dimension_semantics<arbitrary>], iteration_bounds = array<i64: 1, 2>, scalar_prefetch = 1 : i64, scratch_operands = 3 : i64, tpu.core_type = #tpu.core_type<tc>, window_params = [{transform_indices = @transform_0, window_bounds = array<i64: 2, 32, 128>}, {transform_indices = @transform_1, window_bounds = array<i64: 128, 8>}, {pipeline_mode = #tpu.pipeline_mode<synchronous>, transform_indices = @transform_2, window_bounds = array<i64: 1, 8>}, {pipeline_mode = #tpu.pipeline_mode<synchronous>, transform_indices = @transform_3, window_bounds = array<i64: 32, 1>}, {pipeline_mode = #tpu.pipeline_mode<synchronous>, transform_indices = @transform_4, window_bounds = array<i64: 1, 32>}, {pipeline_mode = #tpu.pipeline_mode<synchronous>, transform_indices = @transform_5, window_bounds = array<i64: 8, 8>}, {pipeline_mode = #tpu.pipeline_mode<synchronous>, transform_indices = @transform_6, window_bounds = array<i64: 8, 1>}, {pipeline_mode = #tpu.pipeline_mode<synchronous>, transform_indices = @transform_7, window_bounds = array<i64: 32, 128>}, {pipeline_mode = #tpu.pipeline_mode<synchronous>, transform_indices = @transform_8, window_bounds = array<i64: 1, 128>}, {pipeline_mode = #tpu.pipeline_mode<synchronous>, transform_indices = @transform_9, window_bounds = array<i64: 1, 128>}, {transform_indices = @transform_10, window_bounds = array<i64: 2, 128>}]} {
    %c0_i32 = arith.constant 0 : i32
    %0 = arith.cmpi eq, %arg1, %c0_i32 : i32
    %1 = arith.extui %0 : i1 to i32
    %c0_i32_0 = arith.constant 0 : i32
    %2 = arith.cmpi ne, %1, %c0_i32_0 : i32
    scf.if %2 {
      %cst_10 = arith.constant 0.000000e+00 : f32
      %13 = vector.broadcast %cst_10 : f32 to vector<64x8xf32>
      %c0_11 = arith.constant 0 : index
      %c0_12 = arith.constant 0 : index
      %14 = vector.load %arg14[%c0_11, %c0_12] : memref<64x8xf32, #tpu.memory_space<vmem>>, vector<64x8xf32>
      tpu.vector_store %arg14[%c0_11, %c0_12], %13 {strides = array<i32>} : memref<64x8xf32, #tpu.memory_space<vmem>>, vector<64x8xf32>,
    } else {
    }
    %c0 = arith.constant 0 : index
    %c0_1 = arith.constant 0 : index
    %c0_2 = arith.constant 0 : index
    %3 = vector.load %arg3[%c0, %c0_1, %c0_2] : memref<2x32x128xf32, #tpu.memory_space<vmem>>, vector<2x32x128xf32>
    %4 = vector.shape_cast %3 : vector<2x32x128xf32> to vector<64x128xf32>
    %c0_3 = arith.constant 0 : index
    %c0_4 = arith.constant 0 : index
    %5 = vector.load %arg14[%c0_3, %c0_4] : memref<64x8xf32, #tpu.memory_space<vmem>>, vector<64x8xf32>
    %c0_5 = arith.constant 0 : index
    %c0_6 = arith.constant 0 : index
    %6 = vector.load %arg4[%c0_5, %c0_6] : memref<128x8xf32, #tpu.memory_space<vmem>>, vector<128x8xf32>
    %cst = arith.constant dense<0.000000e+00> : vector<64x8xf32>
    %7 = tpu.matmul %4, %6, %cst {dimension_numbers = #tpu.dot_dimension_numbers<[1], [0], [0], [1], [0, 0, 1, 1], [], []>} : vector<64x128xf32>, vector<128x8xf32>, vector<64x8xf32> -> vector<64x8xf32>
    %8 = arith.addf %5, %7 : vector<64x8xf32>
    %c0_7 = arith.constant 0 : index
    %c0_8 = arith.constant 0 : index
    %9 = vector.load %arg14[%c0_7, %c0_8] : memref<64x8xf32, #tpu.memory_space<vmem>>, vector<64x8xf32>
    tpu.vector_store %arg14[%c0_7, %c0_8], %8 {strides = array<i32>} : memref<64x8xf32, #tpu.memory_space<vmem>>, vector<64x8xf32>,
    %c1_i32 = arith.constant 1 : i32
    %10 = arith.cmpi eq, %arg1, %c1_i32 : i32
    %11 = arith.extui %10 : i1 to i32
    %c0_i32_9 = arith.constant 0 : i32
    %12 = arith.cmpi ne, %11, %c0_i32_9 : i32
    scf.if %12 {
      %c0_10 = arith.constant 0 : index
      %13 = memref.load %arg2[%c0_10] : memref<2xf32, #tpu.memory_space<smem>>
      %c1 = arith.constant 1 : index
      %14 = memref.load %arg2[%c1] : memref<2xf32, #tpu.memory_space<smem>>
      %c0_11 = arith.constant 0 : index
      %c0_12 = arith.constant 0 : index
      %15 = vector.load %arg14[%c0_11, %c0_12] : memref<64x8xf32, #tpu.memory_space<vmem>>, vector<64x8xf32>
      %c0_13 = arith.constant 0 : index
      %c0_14 = arith.constant 0 : index
      %16 = vector.load %arg5[%c0_13, %c0_14] : memref<1x8xf32, #tpu.memory_space<vmem>>, vector<1x8xf32>
      %17 = vector.broadcast %16 : vector<1x8xf32> to vector<64x8xf32>
      %18 = arith.addf %15, %17 : vector<64x8xf32>
      %c0_15 = arith.constant 0 : index
      %c0_16 = arith.constant 0 : index
      %19 = vector.load %arg8[%c0_15, %c0_16] : memref<8x8xf32, #tpu.memory_space<vmem>>, vector<8x8xf32>
      %c0_17 = arith.constant 0 : index
      %c0_18 = arith.constant 0 : index
      %20 = vector.load %arg6[%c0_17, %c0_18] : memref<32x1xf32, #tpu.memory_space<vmem>>, vector<32x1xf32>
      %c0_19 = arith.constant 0 : index
      %c0_20 = arith.constant 0 : index
      %21 = vector.load %arg7[%c0_19, %c0_20] : memref<1x32xf32, #tpu.memory_space<vmem>>, vector<1x32xf32>
      %c0_21 = arith.constant 0 : index
      %c0_22 = arith.constant 0 : index
      %22 = vector.load %arg9[%c0_21, %c0_22] : memref<8x1xf32, #tpu.memory_space<vmem>>, vector<8x1xf32>
      %cst_23 = arith.constant 1.000000e+00 : f32
      %23 = vector.broadcast %cst_23 : f32 to vector<1x8xf32>
      %24 = vector.extract_strided_slice %18 {offsets = [0, 0], sizes = [32, 8], strides = [1, 1]} : vector<64x8xf32> to vector<32x8xf32>
      %cst_24 = arith.constant dense<0.000000e+00> : vector<8x1xf32>
      %25 = tpu.matmul %24, %20, %cst_24 {dimension_numbers = #tpu.dot_dimension_numbers<[0], [0], [1], [1], [0, 1, 1, 1], [], []>} : vector<32x8xf32>, vector<32x1xf32>, vector<8x1xf32> -> vector<8x1xf32>
      %cst_25 = arith.constant dense<0.000000e+00> : vector<1x8xf32>
      %26 = tpu.matmul %21, %24, %cst_25 {dimension_numbers = #tpu.dot_dimension_numbers<[1], [0], [0], [1], [0, 0, 1, 1], [], []>} : vector<1x32xf32>, vector<32x8xf32>, vector<1x8xf32> -> vector<1x8xf32>
      %27 = vector.broadcast %25 : vector<8x1xf32> to vector<8x8xf32>
      %28 = vector.broadcast %26 : vector<1x8xf32> to vector<8x8xf32>
      %29 = arith.subf %27, %28 : vector<8x8xf32>
      %30 = vector.broadcast %14 : f32 to vector<8x8xf32>
      %31 = arith.addf %29, %30 : vector<8x8xf32>
      %32 = math.tanh %31 : vector<8x8xf32>
      %33 = vector.broadcast %13 : f32 to vector<8x8xf32>
      %34 = arith.mulf %32, %33 : vector<8x8xf32>
      %35 = arith.addf %19, %34 : vector<8x8xf32>
      %cst_26 = arith.constant dense<0.000000e+00> : vector<8x1xf32>
      %36 = tpu.matmul %35, %22, %cst_26 {dimension_numbers = #tpu.dot_dimension_numbers<[1], [0], [0], [1], [0, 0, 1, 1], [], []>} : vector<8x8xf32>, vector<8x1xf32>, vector<8x1xf32> -> vector<8x1xf32>
      %cst_27 = arith.constant dense<0.000000e+00> : vector<32x1xf32>
      %37 = tpu.matmul %24, %36, %cst_27 {dimension_numbers = #tpu.dot_dimension_numbers<[1], [0], [0], [1], [0, 0, 1, 1], [], []>} : vector<32x8xf32>, vector<8x1xf32>, vector<32x1xf32> -> vector<32x1xf32>
      %c0_28 = arith.constant 0 : index
      %c0_29 = arith.constant 0 : index
      %38 = vector.load %arg15[%c0_28, %c0_29] : memref<32x2xf32, #tpu.memory_space<vmem>>, vector<32x1xf32>
      tpu.vector_store %arg15[%c0_28, %c0_29], %37 {strides = array<i32>} : memref<32x2xf32, #tpu.memory_space<vmem>>, vector<32x1xf32>,
      %cst_30 = arith.constant dense<0.000000e+00> : vector<1x1xf32>
      %39 = tpu.matmul %23, %36, %cst_30 {dimension_numbers = #tpu.dot_dimension_numbers<[1], [0], [0], [1], [0, 0, 1, 1], [], []>} : vector<1x8xf32>, vector<8x1xf32>, vector<1x1xf32> -> vector<1x1xf32>
      %c0_31 = arith.constant 0 : index
      %c0_32 = arith.constant 0 : index
      %40 = vector.load %arg16[%c0_31, %c0_32] : memref<2x1xf32, #tpu.memory_space<vmem>>, vector<1x1xf32>
      tpu.vector_store %arg16[%c0_31, %c0_32], %39 {strides = array<i32>} : memref<2x1xf32, #tpu.memory_space<vmem>>, vector<1x1xf32>,
      %41 = vector.extract_strided_slice %18 {offsets = [32, 0], sizes = [32, 8], strides = [1, 1]} : vector<64x8xf32> to vector<32x8xf32>
      %cst_33 = arith.constant dense<0.000000e+00> : vector<8x1xf32>
      %42 = tpu.matmul %41, %20, %cst_33 {dimension_numbers = #tpu.dot_dimension_numbers<[0], [0], [1], [1], [0, 1, 1, 1], [], []>} : vector<32x8xf32>, vector<32x1xf32>, vector<8x1xf32> -> vector<8x1xf32>
      %cst_34 = arith.constant dense<0.000000e+00> : vector<1x8xf32>
      %43 = tpu.matmul %21, %41, %cst_34 {dimension_numbers = #tpu.dot_dimension_numbers<[1], [0], [0], [1], [0, 0, 1, 1], [], []>} : vector<1x32xf32>, vector<32x8xf32>, vector<1x8xf32> -> vector<1x8xf32>
      %44 = vector.broadcast %42 : vector<8x1xf32> to vector<8x8xf32>
      %45 = vector.broadcast %43 : vector<1x8xf32> to vector<8x8xf32>
      %46 = arith.subf %44, %45 : vector<8x8xf32>
      %47 = vector.broadcast %14 : f32 to vector<8x8xf32>
      %48 = arith.addf %46, %47 : vector<8x8xf32>
      %49 = math.tanh %48 : vector<8x8xf32>
      %50 = vector.broadcast %13 : f32 to vector<8x8xf32>
      %51 = arith.mulf %49, %50 : vector<8x8xf32>
      %52 = arith.addf %19, %51 : vector<8x8xf32>
      %cst_35 = arith.constant dense<0.000000e+00> : vector<8x1xf32>
      %53 = tpu.matmul %52, %22, %cst_35 {dimension_numbers = #tpu.dot_dimension_numbers<[1], [0], [0], [1], [0, 0, 1, 1], [], []>} : vector<8x8xf32>, vector<8x1xf32>, vector<8x1xf32> -> vector<8x1xf32>
      %cst_36 = arith.constant dense<0.000000e+00> : vector<32x1xf32>
      %54 = tpu.matmul %41, %53, %cst_36 {dimension_numbers = #tpu.dot_dimension_numbers<[1], [0], [0], [1], [0, 0, 1, 1], [], []>} : vector<32x8xf32>, vector<8x1xf32>, vector<32x1xf32> -> vector<32x1xf32>
      %c0_37 = arith.constant 0 : index
      %c1_38 = arith.constant 1 : index
      %55 = vector.load %arg15[%c0_37, %c1_38] : memref<32x2xf32, #tpu.memory_space<vmem>>, vector<32x1xf32>
      tpu.vector_store %arg15[%c0_37, %c1_38], %54 {strides = array<i32>} : memref<32x2xf32, #tpu.memory_space<vmem>>, vector<32x1xf32>,
      %cst_39 = arith.constant dense<0.000000e+00> : vector<1x1xf32>
      %56 = tpu.matmul %23, %53, %cst_39 {dimension_numbers = #tpu.dot_dimension_numbers<[1], [0], [0], [1], [0, 0, 1, 1], [], []>} : vector<1x8xf32>, vector<8x1xf32>, vector<1x1xf32> -> vector<1x1xf32>
      %c1_40 = arith.constant 1 : index
      %c0_41 = arith.constant 0 : index
      %57 = vector.load %arg16[%c1_40, %c0_41] : memref<2x1xf32, #tpu.memory_space<vmem>>, vector<1x1xf32>
      tpu.vector_store %arg16[%c1_40, %c0_41], %56 {strides = array<i32>} : memref<2x1xf32, #tpu.memory_space<vmem>>, vector<1x1xf32>,
      %c0_42 = arith.constant 0 : index
      %c0_43 = arith.constant 0 : index
      %58 = vector.load %arg15[%c0_42, %c0_43] : memref<32x2xf32, #tpu.memory_space<vmem>>, vector<32x2xf32>
      %c0_44 = arith.constant 0 : index
      %c0_45 = arith.constant 0 : index
      %59 = vector.load %arg10[%c0_44, %c0_45] : memref<32x128xf32, #tpu.memory_space<vmem>>, vector<32x128xf32>
      %cst_46 = arith.constant dense<0.000000e+00> : vector<2x128xf32>
      %60 = tpu.matmul %58, %59, %cst_46 {dimension_numbers = #tpu.dot_dimension_numbers<[0], [0], [1], [1], [0, 1, 1, 1], [], []>} : vector<32x2xf32>, vector<32x128xf32>, vector<2x128xf32> -> vector<2x128xf32>
      %c0_47 = arith.constant 0 : index
      %c0_48 = arith.constant 0 : index
      %61 = vector.load %arg16[%c0_47, %c0_48] : memref<2x1xf32, #tpu.memory_space<vmem>>, vector<2x1xf32>
      %c0_49 = arith.constant 0 : index
      %c0_50 = arith.constant 0 : index
      %62 = vector.load %arg11[%c0_49, %c0_50] : memref<1x128xf32, #tpu.memory_space<vmem>>, vector<1x128xf32>
      %63 = vector.broadcast %61 : vector<2x1xf32> to vector<2x128xf32>
      %64 = vector.broadcast %62 : vector<1x128xf32> to vector<2x128xf32>
      %65 = arith.mulf %63, %64 : vector<2x128xf32>
      %66 = arith.addf %60, %65 : vector<2x128xf32>
      %c0_51 = arith.constant 0 : index
      %c0_52 = arith.constant 0 : index
      %67 = vector.load %arg12[%c0_51, %c0_52] : memref<1x128xf32, #tpu.memory_space<vmem>>, vector<1x128xf32>
      %68 = vector.broadcast %67 : vector<1x128xf32> to vector<2x128xf32>
      %69 = arith.addf %66, %68 : vector<2x128xf32>
      %c0_53 = arith.constant 0 : index
      %c0_54 = arith.constant 0 : index
      %70 = vector.load %arg13[%c0_53, %c0_54] : memref<2x128xf32, #tpu.memory_space<vmem>>, vector<2x128xf32>
      tpu.vector_store %arg13[%c0_53, %c0_54], %69 {strides = array<i32>} : memref<2x128xf32, #tpu.memory_space<vmem>>, vector<2x128xf32>,
    } else {
    }
    return
  }
  func.func @transform_0(%arg0: i32, %arg1: i32, %arg2: memref<2xf32, #tpu.memory_space<smem>>) -> (i32, i32, i32) {
    %c0_i32 = arith.constant 0 : i32
    %c0_i32_0 = arith.constant 0 : i32
    return %arg0, %c0_i32, %arg1 : i32, i32, i32
  }
  func.func @transform_1(%arg0: i32, %arg1: i32, %arg2: memref<2xf32, #tpu.memory_space<smem>>) -> (i32, i32) {
    %c0_i32 = arith.constant 0 : i32
    %c0_i32_0 = arith.constant 0 : i32
    return %arg1, %c0_i32 : i32, i32
  }
  func.func @transform_2(%arg0: i32, %arg1: i32, %arg2: memref<2xf32, #tpu.memory_space<smem>>) -> (i32, i32) {
    %c0_i32 = arith.constant 0 : i32
    %c0_i32_0 = arith.constant 0 : i32
    %c0_i32_1 = arith.constant 0 : i32
    return %c0_i32, %c0_i32_0 : i32, i32
  }
  func.func @transform_3(%arg0: i32, %arg1: i32, %arg2: memref<2xf32, #tpu.memory_space<smem>>) -> (i32, i32) {
    %c0_i32 = arith.constant 0 : i32
    %c0_i32_0 = arith.constant 0 : i32
    %c0_i32_1 = arith.constant 0 : i32
    return %c0_i32, %c0_i32_0 : i32, i32
  }
  func.func @transform_4(%arg0: i32, %arg1: i32, %arg2: memref<2xf32, #tpu.memory_space<smem>>) -> (i32, i32) {
    %c0_i32 = arith.constant 0 : i32
    %c0_i32_0 = arith.constant 0 : i32
    %c0_i32_1 = arith.constant 0 : i32
    return %c0_i32, %c0_i32_0 : i32, i32
  }
  func.func @transform_5(%arg0: i32, %arg1: i32, %arg2: memref<2xf32, #tpu.memory_space<smem>>) -> (i32, i32) {
    %c0_i32 = arith.constant 0 : i32
    %c0_i32_0 = arith.constant 0 : i32
    %c0_i32_1 = arith.constant 0 : i32
    return %c0_i32, %c0_i32_0 : i32, i32
  }
  func.func @transform_6(%arg0: i32, %arg1: i32, %arg2: memref<2xf32, #tpu.memory_space<smem>>) -> (i32, i32) {
    %c0_i32 = arith.constant 0 : i32
    %c0_i32_0 = arith.constant 0 : i32
    %c0_i32_1 = arith.constant 0 : i32
    return %c0_i32, %c0_i32_0 : i32, i32
  }
  func.func @transform_7(%arg0: i32, %arg1: i32, %arg2: memref<2xf32, #tpu.memory_space<smem>>) -> (i32, i32) {
    %c0_i32 = arith.constant 0 : i32
    %c0_i32_0 = arith.constant 0 : i32
    %c0_i32_1 = arith.constant 0 : i32
    return %c0_i32, %c0_i32_0 : i32, i32
  }
  func.func @transform_8(%arg0: i32, %arg1: i32, %arg2: memref<2xf32, #tpu.memory_space<smem>>) -> (i32, i32) {
    %c0_i32 = arith.constant 0 : i32
    %c0_i32_0 = arith.constant 0 : i32
    %c0_i32_1 = arith.constant 0 : i32
    return %c0_i32, %c0_i32_0 : i32, i32
  }
  func.func @transform_9(%arg0: i32, %arg1: i32, %arg2: memref<2xf32, #tpu.memory_space<smem>>) -> (i32, i32) {
    %c0_i32 = arith.constant 0 : i32
    %c0_i32_0 = arith.constant 0 : i32
    %c0_i32_1 = arith.constant 0 : i32
    return %c0_i32, %c0_i32_0 : i32, i32
  }
  func.func @transform_10(%arg0: i32, %arg1: i32, %arg2: memref<2xf32, #tpu.memory_space<smem>>) -> (i32, i32) {
    %c0_i32 = arith.constant 0 : i32
    %c0_i32_0 = arith.constant 0 : i32
    return %arg0, %c0_i32 : i32, i32
  }
}

</mosaic_0001>

<bundles_post_ra>
// kernel: tpu_custom_call.1
= control target key start
LH: loop header
LB: loop body
LE: loop exit
PB: predicated region body
PF: predicated region fallthrough
CT: control target
= control target key end

     0   :  { %s2596_s0 = inlined_call_operand.vmem [shape: f32[2], index: 0, kind: input, shape index: {}]   ;;  %s2597_s1 = inlined_call_operand.vmem [shape: f32[2,32,256], index: 1, kind: input, shape index: {}]   ;;  %s2598_s2 = inlined_call_operand.vmem [shape: f32[256,8], index: 2, kind: input, shape index: {}]   ;;  %s2599_s3 = inlined_call_operand.vmem [shape: f32[1,8], index: 3, kind: input, shape index: {}]   ;;  %s2600_s4 = inlined_call_operand.vmem [shape: f32[32,1], index: 4, kind: input, shape index: {}]   ;;  %s2601_s5 = inlined_call_operand.vmem [shape: f32[1,32], index: 5, kind: input, shape index: {}]   ;;  %s2602_s6 = inlined_call_operand.vmem [shape: f32[8,8], index: 6, kind: input, shape index: {}]   ;;  %s2603_s7 = inlined_call_operand.vmem [shape: f32[8,1], index: 7, kind: input, shape index: {}]   ;;  %s2604_s8 = inlined_call_operand.vmem [shape: f32[32,128], index: 8, kind: input, shape index: {}]   ;;  %s2605_s9 = inlined_call_operand.vmem [shape: f32[1,128], index: 9, kind: input, shape index: {}]   ;;  %s2606_s10 = inlined_call_operand.vmem [shape: f32[1,128], index: 10, kind: input, shape index: {}]   ;;  %s2607_s11 = inlined_call_operand.hbm [shape: f32[2,128], index: 11, kind: output, shape index: {}]  }
   0x1   :  { %s16_s19 = sshll.u32 %s2596_s0, 4  ;;  %s17_s19 = int_to_ptr.vmem [resolvable:$true] %s16_s19 }
   0x2   :  { %s2151_s20 = scalar_lea.vmem %s17_s19, 16  ;;  %p2156_p1 = scmp.lt.s32.totalorder %s17_s19, %s17_s19 }
   0x3   :  { %p2152_p0 = scmp.ne.s32.totalorder %s17_s19, %s2151_s20  ;;  %p2157_p2 = scmp.lt.s32.totalorder %s2151_s20, %s2151_s20 }
   0x5   :  { %p2158_p3 = por %p2157_p2, %p2156_p1 }
   0x7   :  { %p2159_p4 = pnand %p2158_p3, %p2152_p0 }
   0x9   :  { %2162 = shalt.err (!%p2159_p4)  }
   0xa   :  { %s2235_s21 = smov [#allocation6]  }
   0xb   :  { %19 = dma.vmem_to_smem %s17_s19, 16, %s2235_s21, [#allocation5] }
   0xc   :  { %2209 = dma.done.wait [#allocation5], 16 }
   0xd   :  { %2210 = vsyncadd [#allocation5], 4294967280 }
   0xe   :  { %21 = sfence }
   0xf   :  { %22 = vsyncpa [#allocation9], 0  ;;  %s2307_s22 = smov 0   ;;  %s2309_s23 = smov 0  }
  0x10   :  { %s2311_s24 = smov 0   ;;  %s2313_s0 = smov 0  }
  0x11   :  { %s2315_s25 = smov 0  }
  0x12 LB: > { %s1774_s26 = sadd.s32 4294967295, %s2233_s25   ;;  %s37_s27 = sadd.s32 1, %s2229_s0  ;;  %s2233_s25 = sphi %s2315_s25, %s28_s25   ;;  %s2229_s0 = sphi %s2313_s0, %s2612_s0   ;;  %s2225_s24 = sphi %s2311_s24, %s2611_s24   ;;  %s2221_s23 = sphi %s2309_s23, %s2610_s23   ;;  %s2217_s22 = sphi %s2307_s22, %s2609_s22  }
  0x13   : > { %p38_p5 = scmp.ge.s32.totalorder %s37_s27, 2  ;;  %p56_p6 = scmp.ne.s32.totalorder %s2221_s23, %s2217_s22 }
  0x14   : > { %p57_p7 = scmp.eq.s32.totalorder %s2233_s25, 0  ;;  %s49_s29 = sadd.s32 1, %s2221_s23 }
  0x15   : > { %s2614_s27 = smov (%p38_p5, %s37_s27), 0  ;;  %p1776_p10 = scmp.ge.s32.totalorder %s2233_s25, 2 }
  0x16   : > { %p58_p8 = por %p57_p7, %p56_p6  ;;  %s45_s28 = ssub.s32 %s2229_s0, %s2614_s27 }
  0x17   : > { %p47_p9 = scmp.eq.s32.totalorder %s45_s28, 0  ;;  %326 = sbr.rel (%p1776_p10) target bundleno = 38 (0x26), region = 48 }
  0x19   : > { %s2343_s30 = scalar_select %p47_p9, %s2221_s23, %s49_s29  }
  0x1e   : > { %329 = sbr.rel (!%p58_p8) target bundleno = 38 (0x26), region = 52  ;;  %s331_s12 = sand.u32 (%p58_p8), 1, %s2221_s23  }
  0x1f   : > { %s1778_s13 = sshll.u32 (%p58_p8), %s2229_s0, 3  ;;  %s1777_s14 = sshll.u32 (%p58_p8), %s331_s12, 6 }
  0x20   : > { %s338_s17 = scalar_lea.vmem (%p58_p8), %s2597_s1, %s1778_s13  ;;  %s333_s18 = scalar_lea.vmem (%p58_p8), [#allocation7], %s1777_s14 }
  0x21   : > { %v380_v0 = vld [vmem:[%s338_s17] sm:$0xff] (%p58_p8)  ;;  %v382_v1 = vld [vmem:[%s338_s17 + $0x10] sm:$0xff] (%p58_p8) }
  0x22   : > { %v384_v2 = vld [vmem:[%s338_s17 + $0x20] sm:$0xff] (%p58_p8)  ;;  %381 = vst [vmem:[%s333_s18] sm:$0xff] (%p58_p8), %v380_v0  ;;  %383 = vst [vmem:[%s333_s18 + $0x8] sm:$0xff] (%p58_p8), %v382_v1  ;;  %v386_v3 = vld [vmem:[%s338_s17 + $0x30] sm:$0xff] (%p58_p8) }
  0x23   : > { %385 = vst [vmem:[%s333_s18 + $0x10] sm:$0xff] (%p58_p8), %v384_v2  ;;  %v388_v4 = vld [vmem:[%s338_s17 + $0x40] sm:$0xff] (%p58_p8)  ;;  %v390_v5 = vld [vmem:[%s338_s17 + $0x50] sm:$0xff] (%p58_p8)  ;;  %387 = vst [vmem:[%s333_s18 + $0x18] sm:$0xff] (%p58_p8), %v386_v3 }
  0x24   : > { %389 = vst [vmem:[%s333_s18 + $0x20] sm:$0xff] (%p58_p8), %v388_v4  ;;  %391 = vst [vmem:[%s333_s18 + $0x28] sm:$0xff] (%p58_p8), %v390_v5  ;;  %v392_v6 = vld [vmem:[%s338_s17 + $0x60] sm:$0xff] (%p58_p8)  ;;  %v394_v7 = vld [vmem:[%s338_s17 + $0x70] sm:$0xff] (%p58_p8) }
  0x25   : > { %393 = vst [vmem:[%s333_s18 + $0x30] sm:$0xff] %v392_v6  ;;  %395 = vst [vmem:[%s333_s18 + $0x38] sm:$0xff] %v394_v7 }
  0x26 PF: > { %p1779_p11 = scmp.ge.s32.totalorder %s2233_s25, 1  ;;  %p409_p12 = scmp.lt.s32.totalorder %s2233_s25, 3 }
  0x28   : > { %p410_p13 = pnand %p1779_p11, %p409_p12 }
  0x29   : > { %s416_s19 = sand.u32 (!%p410_p13), 1, %s2217_s22   ;;  %s1781_s20 = sshll.u32 (!%p410_p13), %s2225_s24, 4 }
  0x2a   : > { %413 = sbr.rel (%p410_p13) target bundleno = 2306 (0x902), region = 94  ;;  %s1780_s21 = sshll.u32 (!%p410_p13), %s416_s19, 6 }
  0x2b   : > { %p455_p0 = scmp.lt.s32.totalorder (!%p410_p13), %s1781_s20, 31  ;;  %s2360_s14 = scalar_lea.vmem (!%p410_p13), [#allocation7], %s1780_s21 }
  0x2c   : > { %p1783_p1 = scmp.ne.s32.totalorder (!%p410_p13), %s2225_s24, 0 }
  0x31   : > { %s2616_s20 = smov (!%p455_p0, %s1781_s20), 31  ;;  %463 = sbr.rel (%p1783_p1) target bundleno = 56 (0x38), region = 102 }
  0x32   : > { %s1782_s28 = sshll.u32 %s2616_s20, 3  ;;  %vm464_vm0 = vcmask (!%p1783_p1), 64512   ;;  %v2236_v8 = vmov (!%p1783_p1), 0.0  }
  0x33   : > { %s2358_s13 = scalar_lea.vmem %s2598_s2, %s1782_s28  ;;  %465 = vst.msk [vmem:[#allocation2] sm:$0xff] (!%p1783_p1), %vm464_vm0, %v2236_v8  ;;  %466 = vst.msk [vmem:[#allocation2 + $0x8] sm:$0xff] (!%p1783_p1), %vm464_vm0, %v2236_v8 }
  0x34   : > { %467 = vst.msk [vmem:[#allocation2 + $0x10] sm:$0xff] (!%p1783_p1), %vm464_vm0, %v2236_v8  ;;  %468 = vst.msk [vmem:[#allocation2 + $0x18] sm:$0xff] (!%p1783_p1), %vm464_vm0, %v2236_v8 }
  0x35   : > { %469 = vst.msk [vmem:[#allocation2 + $0x20] sm:$0xff] (!%p1783_p1), %vm464_vm0, %v2236_v8  ;;  %470 = vst.msk [vmem:[#allocation2 + $0x28] sm:$0xff] (!%p1783_p1), %vm464_vm0, %v2236_v8 }
  0x36   : > { %471 = vst.msk [vmem:[#allocation2 + $0x30] sm:$0xff] (!%p1783_p1), %vm464_vm0, %v2236_v8  ;;  %472 = vst.msk [vmem:[#allocation2 + $0x38] sm:$0xff] (!%p1783_p1), %vm464_vm0, %v2236_v8 }
  0x38 PF: > { %v489_v9 = vld [vmem:[%s2358_s13] sm:$0xff]  ;;  %v490_v10 = vld [vmem:[%s2358_s13 + $0x8] sm:$0xff]  ;;  %v491_v11 = vld [vmem:[%s2358_s13 + $0x10] sm:$0xff]  ;;  %vm618_vm1 = vcmask 64512   ;;  %p1784_p2 = scmp.ne.s32.totalorder %s2225_s24, 1 }
  0x39   : > { %v2012_v12 = vpack.c.bf16 %v490_v10, %v489_v9  ;;  %v492_v13 = vld [vmem:[%s2358_s13 + $0x18] sm:$0xff]  ;;  %v493_v15 = vld [vmem:[%s2358_s13 + $0x20] sm:$0xff]  ;;  %v494_v16 = vld [vmem:[%s2358_s13 + $0x28] sm:$0xff]  ;;  %v2237_v7 = vmov (!%p1784_p2), 0.0|0.0   ;;  %vm2238_vm2 = vmmov (!%p1784_p2), 0   ;;  %vm695_vm3 = vcmask (!%p1784_p2), 261120  }
  0x3a   : > { %v2016_v14 = vpack.c.bf16 %v492_v13, %v491_v11  ;;  %v2020_v17 = vpack.c.bf16 %v494_v16, %v493_v15  ;;  %v473_v18 = vld [vmem:[%s2360_s14] sm:$0xff]  ;;  %v495_v20 = vld [vmem:[%s2358_s13 + $0x30] sm:$0xff]  ;;  %v496_v21 = vld [vmem:[%s2358_s13 + $0x38] sm:$0xff]  ;;  %v2239_v13 = vmov (!%p1784_p2), 0.0   ;;  %s2469_s22 = sld [smem:[#allocation6 + $0x1]] (!%p1784_p2)  ;;  %s2477_s15 = sld [smem:[#allocation6]] (!%p1784_p2) }
  0x3b   : > { %2013 = vmatprep.subr.bf16.mxu0 %v2012_v12  ;;  %2074 = vmatprep.subr.bf16.mxu1 %v2012_v12  ;;  %v477_v19 = vld [vmem:[%s2360_s14 + $0x20] sm:$0xff]  ;;  %v2024_v22 = vpack.c.bf16 %v496_v21, %v495_v20  ;;  %v499_v26 = vld [vmem:[%s2358_s13 + $0x50] sm:$0xff]  ;;  %v500_v27 = vld [vmem:[%s2358_s13 + $0x58] sm:$0xff]  ;;  %vm1028_vm4 = vcmask (!%p1784_p2), 7168   ;;  %vm1106_vm5 = vcmask (!%p1784_p2), 0   ;;  %s2242_s24 = smov (!%p1784_p2), 1  }
  0x3c   : > { %2015 = vmatpush3.bf16.msra.mxu0 %v2012_v12  ;;  %2082 = vmatpush3.bf16.msra.mxu1 %v2012_v12  ;;  %v497_v23 = vld [vmem:[%s2358_s13 + $0x40] sm:$0xff]  ;;  %v498_v24 = vld [vmem:[%s2358_s13 + $0x48] sm:$0xff]  ;;  %v2032_v28 = vpack.c.bf16 %v500_v27, %v499_v26  ;;  %v503_v32 = vld [vmem:[%s2358_s13 + $0x70] sm:$0xff]  ;;  %vm1483_vm6 = vcmask (!%p1784_p2), 15368  }
  0x3d   : > { %2017 = vmatprep.subr.bf16.mxu0 %v2016_v14  ;;  %2075 = vmatprep.subr.bf16.mxu1 %v2016_v14  ;;  %v2028_v25 = vpack.c.bf16 %v498_v24, %v497_v23  ;;  %v501_v29 = vld [vmem:[%s2358_s13 + $0x60] sm:$0xff]  ;;  %v502_v30 = vld [vmem:[%s2358_s13 + $0x68] sm:$0xff]  ;;  %v504_v33 = vld [vmem:[%s2358_s13 + $0x78] sm:$0xff] }
  0x3e   : > { %1909 = vmatprep.mubr.f32.mxu0 %v473_v18  ;;  %1915 = vmatprep.mubr.f32.mxu1 %v477_v19  ;;  %v2036_v31 = vpack.c.bf16 %v502_v30, %v501_v29  ;;  %v2040_v34 = vpack.c.bf16 %v504_v33, %v503_v32  ;;  %v474_v35 = vld [vmem:[%s2360_s14 + $0x8] sm:$0xff]  ;;  %v475_v37 = vld [vmem:[%s2360_s14 + $0x10] sm:$0xff]  ;;  %v476_v39 = vld [vmem:[%s2360_s14 + $0x18] sm:$0xff]  ;;  %v2240_v19 = vmov (!%p1784_p2), 0  }
  0x3f   : > { %v478_v36 = vld [vmem:[%s2360_s14 + $0x28] sm:$0xff]  ;;  %v479_v38 = vld [vmem:[%s2360_s14 + $0x30] sm:$0xff]  ;;  %v480_v40 = vld [vmem:[%s2360_s14 + $0x38] sm:$0xff]  ;;  %2145 = vset.pattern.permute.xlu1 (!%p1784_p2), %v2240_v19 }
  0x40   : > { %2019 = vmatpush3.bf16.msra.mxu0 %v2016_v14  ;;  %2083 = vmatpush3.bf16.msra.mxu1 %v2016_v14  ;;  %v482_v41 = vld [vmem:[#allocation2 + $0x8] sm:$0xff]  ;;  %v481_v43 = vld [vmem:[#allocation2] sm:$0xff]  ;;  %v484_v53 = vld [vmem:[#allocation2 + $0x18] sm:$0xff] }
  0x41   : > { %2021 = vmatprep.subr.bf16.mxu0 %v2020_v17  ;;  %2076 = vmatprep.subr.bf16.mxu1 %v2020_v17  ;;  %v486_v42 = vld [vmem:[#allocation2 + $0x28] sm:$0xff]  ;;  %v485_v44 = vld [vmem:[#allocation2 + $0x20] sm:$0xff]  ;;  %v488_v54 = vld [vmem:[#allocation2 + $0x38] sm:$0xff] }
  0x42   : > { %v483_v55 = vld [vmem:[#allocation2 + $0x10] sm:$0xff]  ;;  %v1786_v2 = vld [vmem:[%s2599_s3] ss:$0 sm:$0xff] (!%p1784_p2)  ;;  %v658_v10 = vld [vmem:[%s2600_s4 + $0x8] sm:$0xff] (!%p1784_p2) }
  0x43   : > { %v487_v56 = vld [vmem:[#allocation2 + $0x30] sm:$0xff]  ;;  %v657_v8 = vld [vmem:[%s2600_s4] sm:$0xff] (!%p1784_p2)  ;;  %v660_v12 = vld [vmem:[%s2600_s4 + $0x18] sm:$0xff] (!%p1784_p2) }
  0x44   : > { %2023 = vmatpush3.bf16.msra.mxu0 %v2020_v17  ;;  %2084 = vmatpush3.bf16.msra.mxu1 %v2020_v17  ;;  %v659_v11 = vld [vmem:[%s2600_s4 + $0x10] sm:$0xff] (!%p1784_p2)  ;;  %v2422_v14 = vpack.c.bf16 (!%p1784_p2), %v658_v10, %v657_v8  ;;  %v2442_v21 = vld [vmem:[%s2601_s5] sm:$0x1] (!%p1784_p2) }
  0x45   : > { %2025 = vmatprep.subr.bf16.mxu0 %v2024_v22  ;;  %2077 = vmatprep.subr.bf16.mxu1 %v2024_v22  ;;  %v2431_v18 = vpack.c.bf16 (!%p1784_p2), %v660_v12, %v659_v11  ;;  %v662_v27 = vld [vmem:[%s2603_s7] sm:$0xff] (!%p1784_p2) }
  0x48   : > { %2027 = vmatpush3.bf16.msra.mxu0 %v2024_v22  ;;  %2085 = vmatpush3.bf16.msra.mxu1 %v2024_v22 }
  0x49   : > { %2029 = vmatprep.subr.bf16.mxu0 %v2028_v25  ;;  %2078 = vmatprep.subr.bf16.mxu1 %v2028_v25 }
  0x4c   : > { %2031 = vmatpush3.bf16.msra.mxu0 %v2028_v25  ;;  %2086 = vmatpush3.bf16.msra.mxu1 %v2028_v25 }
  0x4d   : > { %2033 = vmatprep.subr.bf16.mxu0 %v2032_v28  ;;  %2079 = vmatprep.subr.bf16.mxu1 %v2032_v28 }
  0x50   : > { %2035 = vmatpush3.bf16.msra.mxu0 %v2032_v28  ;;  %2087 = vmatpush3.bf16.msra.mxu1 %v2032_v28 }
  0x51   : > { %2037 = vmatprep.subr.bf16.mxu0 %v2036_v31  ;;  %2080 = vmatprep.subr.bf16.mxu1 %v2036_v31 }
  0x54   : > { %2039 = vmatpush3.bf16.msra.mxu0 %v2036_v31  ;;  %2088 = vmatpush3.bf16.msra.mxu1 %v2036_v31 }
  0x55   : > { %2041 = vmatprep.subr.bf16.mxu0 %v2040_v34  ;;  %2081 = vmatprep.subr.bf16.mxu1 %v2040_v34 }
  0x58   : > { %2043 = vmatpush3.bf16.msra.mxu0 %v2040_v34  ;;  %2089 = vmatpush3.bf16.msra.mxu1 %v2040_v34 }
  0x59   : > { %2044 = vmatprep.subr.bf16.mxu0 (!%p1784_p2), %v2237_v7  ;;  %2050 = vmatprep.subr.bf16.mxu1 (!%p1784_p2), %v2237_v7 }
  0x5b   : > { %1910 = vmatmul.mubr.f32.vlgmr.msra.gmra.mrb[0].mxu0 %v474_v35  ;;  %1916 = vmatmul.mubr.f32.vlgmr.msra.gmra.mrb[0].mxu1 %v478_v36  ;;  %v847_v36 = vlaneseq (!%p1784_p2) }
  0x5c   : > { %1912 = vmatprep.mubr.f32.mxu0 %v475_v37  ;;  %1918 = vmatprep.mubr.f32.mxu1 %v479_v38 }
  0x5d   : > { %2046 = vmatpush3.bf16.msra.mxu0 (!%p1784_p2), %v2422_v14  ;;  %v2467_v37 = vshrl.u32 (!%p1784_p2), %v847_v36, 7  ;;  %v1805_v36 = vld [vmem:[%s2606_s10] ss:$0 sm:$0xff] (!%p1784_p2) }
  0x5e   : > { %2047 = vmatprep.subr.bf16.mxu0 (!%p1784_p2), %v2237_v7 }
  0x5f   : > { %1913 = vmatmul.mubr.f32.gmra.mrb[2].mxu0 %v476_v39  ;;  %1919 = vmatmul.mubr.f32.gmra.mrb[2].mxu1 %v480_v40  ;;  %v849_v38 = vsub.s32 (!%p1784_p2), 0, %v2467_v37 }
  0x60   : > { %1929 = vmatprep.mubr.msk.f32.mxu0 (!%p1784_p2), %vm2238_vm2, %v2239_v13  ;;  %1940 = vmatprep.mubr.msk.f32.mxu1 (!%p1784_p2), %vm2238_vm2, %v2239_v13 }
  0x61   : > { %2049 = vmatpush3.bf16.msra.mxu0 (!%p1784_p2), %v2431_v18 }
  0x62   : > { %1956 = vmatprep.subr.mxu0 (!%p1784_p2), %v2239_v13 }
 0x12e   : > { %v1911_v45 = vpop.f32.mrb[0].mxu0  ;;  %v1917_v46 = vpop.f32.mrb[0].mxu1 }
 0x12f   : > { %v611_v47 = vadd.f32 %v1911_v45, %v482_v41  ;;  %v615_v48 = vadd.f32 %v1917_v46, %v486_v42  ;;  %v571_v49 = vpop.f32.mrb[1].mxu0  ;;  %v591_v50 = vpop.f32.mrb[1].mxu1  ;;  %v852_v41 = vstv (!%p1784_p2), %s2469_s22  ;;  %v656_v46 = vld [vmem:[%s2602_s6] sm:$0xff] (!%p1784_p2) }
 0x130   : > { %v610_v51 = vadd.f32 %v571_v49, %v481_v43  ;;  %v614_v52 = vadd.f32 %v591_v50, %v485_v44  ;;  %630 = sbr.rel (%p1784_p2) target bundleno = 2281 (0x8e9), region = 106  ;;  %v855_v44 = vstv (!%p1784_p2), %s2477_s15 }
 0x131   : > { %620 = vst.msk [vmem:[#allocation2 + $0x8] sm:$0xff] %vm618_vm1, %v611_v47  ;;  %624 = vst.msk [vmem:[#allocation2 + $0x28] sm:$0xff] %vm618_vm1, %v615_v48 }
 0x132   : > { %619 = vst.msk [vmem:[#allocation2] sm:$0xff] %vm618_vm1, %v610_v51  ;;  %623 = vst.msk [vmem:[#allocation2 + $0x20] sm:$0xff] %vm618_vm1, %v614_v52  ;;  %v1914_v57 = vpop.f32.mrb[2].mxu0  ;;  %v1920_v58 = vpop.f32.mrb[2].mxu1  ;;  %v2241_v52 = vmov (!%p1784_p2), 1.0  }
 0x133   : > { %v613_v59 = vadd.f32 %v1914_v57, %v484_v53  ;;  %v617_v60 = vadd.f32 %v1920_v58, %v488_v54  ;;  %v581_v61 = vpop.f32.mrb[3].mxu0  ;;  %v601_v62 = vpop.f32.mrb[3].mxu1 }
 0x134   : > { %v612_v63 = vadd.f32 %v581_v61, %v483_v55  ;;  %v616_v0 = vadd.f32 %v601_v62, %v487_v56 }
 0x135   : > { %622 = vst.msk [vmem:[#allocation2 + $0x18] sm:$0xff] %vm618_vm1, %v613_v59  ;;  %626 = vst.msk [vmem:[#allocation2 + $0x38] sm:$0xff] %vm618_vm1, %v617_v60 }
 0x136   : > { %621 = vst.msk [vmem:[#allocation2 + $0x10] sm:$0xff] %vm618_vm1, %v612_v63  ;;  %625 = vst.msk [vmem:[#allocation2 + $0x30] sm:$0xff] %vm618_vm1, %v616_v0 }
 0x138   : > { %v634_v3 = vld [vmem:[#allocation2 + $0x8] sm:$0xff] }
 0x139   : > { %v633_v1 = vld [vmem:[#allocation2] sm:$0xff]  ;;  %v2406_v9 = vadd.f32 %v1786_v2, %v634_v3  ;;  %v638_v30 = vld [vmem:[#allocation2 + $0x28] sm:$0xff] }
 0x13a   : > { %v2399_v4 = vadd.f32 %v1786_v2, %v633_v1  ;;  %v637_v28 = vld [vmem:[#allocation2 + $0x20] sm:$0xff]  ;;  %v2458_v31 = vadd.f32 %v1786_v2, %v638_v30 }
 0x13b   : > { %v652_v29 = vadd.f32 %v1786_v2, %v637_v28 }
 0x13c   : > { %v636_v6 = vld [vmem:[#allocation2 + $0x18] sm:$0xff]  ;;  %663 = vxpose.xlu0.b32.start [1/4] (short) (narrow) %v2399_v4, 8  ;;  %v2051_v17 = vpack.c.bf16 %v2406_v9, %v2399_v4 }
 0x13d   : > { %v635_v5 = vld [vmem:[#allocation2 + $0x10] sm:$0xff]  ;;  %v2426_v16 = vadd.f32 %v1786_v2, %v636_v6  ;;  %v640_v34 = vld [vmem:[#allocation2 + $0x38] sm:$0xff]  ;;  %v2063_v51 = vpack.c.bf16 %v2458_v31, %v652_v29 }
 0x13e   : > { %v2424_v15 = vadd.f32 %v1786_v2, %v635_v5  ;;  %2052 = vmatpush3.bf16.msra.mxu1 %v2051_v17  ;;  %v639_v32 = vld [vmem:[#allocation2 + $0x30] sm:$0xff]  ;;  %v2464_v35 = vadd.f32 %v1786_v2, %v640_v34 }
 0x13f   : > { %2053 = vmatprep.subr.bf16.mxu1 %v2237_v7  ;;  %v2461_v33 = vadd.f32 %v1786_v2, %v639_v32 }
 0x140   : > { %v2054_v20 = vpack.c.bf16 %v2426_v16, %v2424_v15  ;;  %664 = vxpose.xlu0.b32.cont [2/4] (short) (narrow) %v2406_v9, 8 }
 0x141   : > { %v2066_v53 = vpack.c.bf16 %v2464_v35, %v2461_v33 }
 0x142   : > { %2055 = vmatpush3.bf16.msra.mxu1 %v2054_v20  ;;  %v1565_v20 = vld [vmem:[%s2604_s8 + $0x10] sm:$0xff] }
 0x143   : > { %1943 = vmatprep.subr.mxu1 %v2239_v13 }
 0x144   : > { %665 = vxpose.xlu0.b32.cont [3/4] (short) (narrow) %v2424_v15, 8 }
 0x145   : > { %1941 = vmatmul.mubr.msk.f32.vlgmr.msra.gmra.mrb[0].mxu1 %vm695_vm3, %v2442_v21 }
 0x146   : > { %1945 = vmatprep.mubr.msk.f32.mxu1 %vm2238_vm2, %v2239_v13  ;;  %1944 = vmatpush3.msra.mxu1 %v662_v27 }
 0x148   : > { %666 = vxpose.xlu0.b32.end [4/4] (short) (narrow) %v2426_v16, 8 }
 0x171   : > { %2146 = vset.pattern.permute.xlu0 %v2240_v19  ;;  %v1563_v19 = vld [vmem:[%s2604_s8] sm:$0xff] }
 0x1bc   : > { %v679_v22 = vpop.trf.xlu0 }
 0x1bd   : > { %1930 = vmatmul.mubr.msk.f32.vlgmr.msra.gmra.mrb[0].mxu0 %vm695_vm3, %v679_v22  ;;  %v1566_v22 = vld [vmem:[%s2604_s8 + $0x18] sm:$0xff] }
 0x1be   : > { %1958 = vmatprep.mubr.msk.f32.mxu0 %vm2238_vm2, %v2239_v13 }
 0x218   : > { %v838_v23 = vpop.f32.mrb[0].mxu1 }
 0x219   : > { %v1942_v24 = vpop.f32.mrb[1].mxu1  ;;  %v850_v39 = vrot.slane %v838_v23, %v849_v38  ;;  %v2072_v23 = vpack.c.bf16 %v1566_v22, %v1565_v20 }
 0x290   : > { %v765_v25 = vpop.f32.mrb[0].mxu0 }
 0x291   : > { %844 = vperm.xlu1 %2145, %v765_v25   ;;  %v1931_v26 = vpop.f32.mrb[1].mxu0 }
 0x2ba   : > { %1108 = vxpose.xlu1.b32.start [1/4] (short) (narrow) %v652_v29, 8 }
 0x2be   : > { %1109 = vxpose.xlu1.b32.cont [2/4] (short) (narrow) %v2458_v31, 8 }
 0x2c2   : > { %1110 = vxpose.xlu1.b32.cont [3/4] (short) (narrow) %v2461_v33, 8 }
 0x2c6   : > { %1111 = vxpose.xlu1.b32.end [4/4] (short) (narrow) %v2464_v35, 8 }
 0x310   : > { %v845_v40 = vpop.permute.xlu1 %844 }
 0x311   : > { %v851_v42 = vsub.f32 %v845_v40, %v850_v39 }
 0x313   : > { %v853_v43 = vadd.f32 %v852_v41, %v851_v42 }
 0x315   : > { %2147 = vtanh.f32 %v853_v43 }
 0x31f   : > { %v2148_v45 = vpop.eup %2147 }
 0x320   : > { %v856_v47 = vmul.f32 %v2148_v45, %v855_v44 }
 0x322   : > { %v857_v48 = vadd.f32 %v856_v47, %v656_v46 }
 0x324   : > { %1946 = vmatmul.mubr.msk.f32.vlgmr.msra.gmra.mrb[2].mxu1 %vm618_vm1, %v857_v48 }
 0x325   : > { %1950 = vmatprep.mubr.msk.f32.mxu1 %vm618_vm1, %v2399_v4 }
 0x33a   : > { %v1124_v54 = vpop.trf.xlu1 }
 0x3f7   : > { %v927_v49 = vpop.f32.mrb[2].mxu1 }
 0x3f8   : > { %v1947_v50 = vpop.f32.mrb[3].mxu1  ;;  %1948 = vmatprep.subr.mxu1 %v927_v49  ;;  %1957 = vmatpush3.msra.mxu0 %v927_v49 }
 0x3f9   : > { %1949 = vmatpush3.msra.mxu1 %v927_v49  ;;  %2062 = vmatprep.subr.bf16.mxu0 %v2237_v7 }
 0x3fa   : > { %1951 = vmatmul.mubr.msk.f32.vlgmr.msra.gmra.mrb[4].mxu1 %vm618_vm1, %v2406_v9  ;;  %2056 = vmatprep.subr.bf16.mxu1 %v2237_v7 }
 0x3fb   : > { %2058 = vmatpush3.bf16.msra.mxu1 %v2422_v14  ;;  %1953 = vmatprep.mubr.msk.f32.mxu1 %vm618_vm1, %v2424_v15 }
 0x3fc   : > { %2059 = vmatprep.subr.bf16.mxu1 %v2237_v7  ;;  %1959 = vmatmul.mubr.msk.f32.vlgmr.msra.gmra.mrb[2].mxu0 %vm618_vm1, %v2241_v52 }
 0x3fd   : > { %2064 = vmatpush3.bf16.msra.mxu0 %v2063_v51  ;;  %1980 = vmatprep.mubr.msk.f32.mxu0 %vm2238_vm2, %v2239_v13 }
 0x3fe   : > { %1954 = vmatmul.mubr.msk.f32.gmra.mrb[6].mxu1 %vm618_vm1, %v2426_v16  ;;  %2065 = vmatprep.subr.bf16.mxu0 %v2237_v7 }
 0x3ff   : > { %2061 = vmatpush3.bf16.msra.mxu1 %v2431_v18  ;;  %1969 = vmatprep.mubr.msk.f32.mxu1 %vm2238_vm2, %v2239_v13 }
 0x400   : > { %1983 = vmatprep.subr.mxu1 %v2239_v13 }
 0x401   : > { %2067 = vmatpush3.bf16.msra.mxu0 %v2066_v53 }
 0x402   : > { %1970 = vmatmul.mubr.msk.f32.vlgmr.msra.gmra.mrb[8].mxu1 %vm695_vm3, %v1124_v54 }
 0x403   : > { %1984 = vmatpush3.msra.mxu1 %v662_v27  ;;  %1985 = vmatprep.mubr.msk.f32.mxu1 %vm2238_vm2, %v2239_v13 }
 0x404   : > { %1981 = vmatmul.mubr.msk.f32.vlgmr.msra.gmra.mrb[4].mxu0 %vm695_vm3, %v2442_v21  ;;  %1996 = vmatprep.subr.mxu1 %v2239_v13 }
 0x405   : > { %1990 = vmatprep.mubr.msk.f32.mxu0 %vm618_vm1, %v652_v29 }
 0x4cd   : > { %v1952_v55 = vpop.f32.mrb[4].mxu1 }
 0x4ce   : > { %1030 = vst.msk [vmem:[#allocation3 + $0x8] sm:$0xff] %vm1028_vm4, %v1952_v55  ;;  %v1009_v56 = vpop.f32.mrb[5].mxu1 }
 0x4cf   : > { %1029 = vst.msk [vmem:[#allocation3] sm:$0xff] %vm1028_vm4, %v1009_v56  ;;  %v1102_v57 = vpop.f32.mrb[2].mxu0 }
 0x4d0   : > { %1107 = vst.msk [vmem:[#allocation4] sm:$0x1] %vm1106_vm5, %v1102_v57  ;;  %v1960_v58 = vpop.f32.mrb[3].mxu0 }
 0x4d1   : > { %v1955_v59 = vpop.f32.mrb[6].mxu1 }
 0x4d2   : > { %1032 = vst.msk [vmem:[#allocation3 + $0x18] sm:$0xff] %vm1028_vm4, %v1955_v59  ;;  %v1019_v60 = vpop.f32.mrb[7].mxu1 }
 0x4d3   : > { %1031 = vst.msk [vmem:[#allocation3 + $0x10] sm:$0xff] %vm1028_vm4, %v1019_v60 }
 0x4d5   : > { %v1209_v61 = vpop.f32.mrb[8].mxu1 }
 0x4d6   : > { %1285 = vperm.xlu0 %2146, %v1209_v61   ;;  %v1971_v62 = vpop.f32.mrb[9].mxu1 }
 0x4d7   : > { %v1279_v63 = vpop.f32.mrb[4].mxu0 }
 0x4d8   : > { %v1982_v0 = vpop.f32.mrb[5].mxu0  ;;  %v1291_v1 = vrot.slane %v1279_v63, %v849_v38 }
 0x555   : > { %v1286_v2 = vpop.permute.xlu0 %1285 }
 0x556   : > { %v1292_v3 = vsub.f32 %v1286_v2, %v1291_v1 }
 0x558   : > { %v1293_v4 = vadd.f32 %v1292_v3, %v852_v41 }
 0x55a   : > { %2149 = vtanh.f32 %v1293_v4 }
 0x564   : > { %v2150_v5 = vpop.eup %2149 }
 0x565   : > { %v1295_v6 = vmul.f32 %v2150_v5, %v855_v44 }
 0x567   : > { %v1296_v8 = vadd.f32 %v1295_v6, %v656_v46 }
 0x569   : > { %1986 = vmatmul.mubr.msk.f32.vlgmr.msra.gmra.mrb[10].mxu1 %vm618_vm1, %v1296_v8 }
 0x56a   : > { %1998 = vmatprep.mubr.msk.f32.mxu1 %vm2238_vm2, %v2239_v13 }
 0x63c   : > { %v1366_v9 = vpop.f32.mrb[10].mxu1 }
 0x63d   : > { %v1987_v10 = vpop.f32.mrb[11].mxu1  ;;  %1988 = vmatprep.subr.mxu0 %v1366_v9  ;;  %1997 = vmatpush3.msra.mxu1 %v1366_v9 }
 0x63e   : > { %1989 = vmatpush3.msra.mxu0 %v1366_v9  ;;  %1999 = vmatmul.mubr.msk.f32.vlgmr.msra.gmra.mrb[12].mxu1 %vm618_vm1, %v2241_v52 }
 0x63f   : > { %1991 = vmatmul.mubr.msk.f32.vlgmr.msra.gmra.mrb[6].mxu0 %vm618_vm1, %v2458_v31  ;;  %2068 = vmatprep.subr.bf16.mxu0 %v2237_v7 }
 0x640   : > { %1993 = vmatprep.mubr.msk.f32.mxu0 %vm618_vm1, %v2461_v33 }
 0x643   : > { %1994 = vmatmul.mubr.msk.f32.gmra.mrb[8].mxu0 %vm618_vm1, %v2464_v35 }
 0x644   : > { %2009 = vmatprep.mubr.msk.f32.mxu0 %vm2238_vm2, %v2239_v13  ;;  %v1564_v13 = vld [vmem:[%s2604_s8 + $0x8] sm:$0xff] }
 0x645   : > { %v2069_v21 = vpack.c.bf16 %v1564_v13, %v1563_v19 }
 0x647   : > { %2070 = vmatpush3.bf16.msra.mxu0 %v2069_v21 }
 0x648   : > { %2071 = vmatprep.subr.bf16.mxu0 %v2237_v7  ;;  %v1803_v7 = vld [vmem:[%s2605_s9] ss:$0 sm:$0xff] }
 0x64b   : > { %2073 = vmatpush3.bf16.msra.mxu0 %v2072_v23 }
 0x711   : > { %v1554_v11 = vpop.f32.mrb[12].mxu1 }
 0x712   : > { %1558 = vst.msk [vmem:[#allocation4 + $0x1] sm:$0x1] %vm1106_vm5, %v1554_v11  ;;  %v1992_v12 = vpop.f32.mrb[6].mxu0  ;;  %v2000_v14 = vpop.f32.mrb[13].mxu1 }
 0x713   : > { %v1448_v15 = vpop.f32.mrb[7].mxu0  ;;  %1473 = vrot.lane.b32.xlu1 %v1992_v12, %s2242_s24 }
 0x714   : > { %1471 = vrot.lane.b32.xlu0 %v1448_v15, %s2242_s24 }
 0x716   : > { %v1995_v16 = vpop.f32.mrb[8].mxu0 }
 0x717   : > { %v1458_v17 = vpop.f32.mrb[9].mxu0 }
 0x718   : > { %1475 = vrot.lane.b32.xlu0 %v1458_v17, %s2242_s24 }
 0x719   : > { %v1567_v18 = vld [vmem:[#allocation4] sm:$0x3] }
 0x71a   : > { %1571 = vperm.xlu1 %2145, %v1567_v18  }
 0x71c   : > { %1477 = vrot.lane.b32.xlu0 %v1995_v16, %s2242_s24 }
 0x785   : > { %v1474_v24 = vpop.permute.xlu1 %1473 }
 0x786   : > { %v1472_v25 = vpop.permute.xlu0 %1471  ;;  %1485 = vst.msk [vmem:[#allocation3 + $0x8] sm:$0xff] %vm1483_vm6, %v1474_v24 }
 0x787   : > { %1484 = vst.msk [vmem:[#allocation3] sm:$0xff] %vm1483_vm6, %v1472_v25 }
 0x78a   : > { %v1476_v26 = vpop.permute.xlu0 %1475 }
 0x78b   : > { %1486 = vst.msk [vmem:[#allocation3 + $0x10] sm:$0xff] %vm1483_vm6, %v1476_v26 }
 0x78d   : > { %v1560_v29 = vld [vmem:[#allocation3 + $0x8] sm:$0xff] }
 0x78e   : > { %v1559_v27 = vld [vmem:[#allocation3] sm:$0xff]  ;;  %v1478_v28 = vpop.permute.xlu0 %1477 }
 0x78f   : > { %1581 = vxpose.xlu0.b32.start [1/4] (short) (narrow) %v1559_v27, 8  ;;  %1487 = vst.msk [vmem:[#allocation3 + $0x18] sm:$0xff] %vm1483_vm6, %v1478_v28 }
 0x792   : > { %v1561_v30 = vld [vmem:[#allocation3 + $0x10] sm:$0xff] }
 0x793   : > { %1582 = vxpose.xlu0.b32.cont [2/4] (short) (narrow) %v1560_v29, 8 }
 0x796   : > { %v1562_v31 = vld [vmem:[#allocation3 + $0x18] sm:$0xff] }
 0x797   : > { %1583 = vxpose.xlu0.b32.cont [3/4] (short) (narrow) %v1561_v30, 8 }
 0x799   : > { %v1572_v33 = vpop.permute.xlu1 %1571 }
 0x79a   : > { %v1580_v34 = vmul.f32 %v1803_v7, %v1572_v33 }
 0x79b   : > { %1584 = vxpose.xlu0.b32.end [4/4] (short) (narrow) %v1562_v31, 8 }
 0x80f   : > { %v1597_v32 = vpop.trf.xlu0 }
 0x810   : > { %2010 = vmatmul.mubr.msk.f32.vlgmr.msra.gmra.mrb[10].mxu0 %vm695_vm3, %v1597_v32 }
 0x8e3   : > { %v1682_v35 = vpop.f32.mrb[10].mxu0 }
 0x8e4   : > { %v1683_v37 = vadd.f32 %v1682_v35, %v1580_v34  ;;  %v2011_v38 = vpop.f32.mrb[11].mxu0 }
 0x8e6   : > { %v1693_v39 = vadd.f32 %v1805_v36, %v1683_v37 }
 0x8e8   : > { %1694 = vst [vmem:[#allocation8] sm:$0x3] %v1693_v39 }
 0x8e9 PF: > { %p2555_p3 = scmp.eq.s32.totalorder %s1774_s26, 1  ;;  %s2243_s24 = smov [#allocation8]  }
 0x8ea   : > { %s1704_s18 = sshll.u32 %s2243_s24, 4  ;;  %s1705_s18 = int_to_ptr.vmem [resolvable:$true] %s1704_s18 }
 0x8eb   : > { %s2163_s19 = scalar_lea.vmem %s1705_s18, 32  ;;  %p2170_p7 = scmp.lt.s32.totalorder %s1705_s18, %s1705_s18 }
 0x8ec   : > { %p2164_p4 = scmp.ne.s32.totalorder %s1705_s18, %s2163_s19  ;;  %p2171_p8 = scmp.lt.s32.totalorder %s2163_s19, %s2163_s19 }
 0x8ee   : > { %p2165_p5 = pnand %p2164_p4, %p2555_p3  ;;  %p2172_p9 = por %p2171_p8, %p2170_p7 }
 0x8f0   : > { %p2166_p6 = pneg %p2165_p5 }
 0x8f2   : > { %p2173_p10 = pnand %p2172_p9, %p2166_p6 }
 0x8f4   : > { %2176 = shalt.err (!%p2173_p10)
}
 0x8f5   : > { %s2177_s26 = scalar_lea.hbm %s2607_s11, 32 }
 0x8f6   : > { %p2178_p11 = scmp.ne.s32.totalorder %s2607_s11, %s2177_s26  ;;  %p2183_p0 = scmp.lt.u32.totalorder %s2177_s26, %s2607_s11 }
 0x8f8   : > { %p2179_p12 = pnand %p2178_p11, %p2555_p3 }
 0x8fa   : > { %p2180_p13 = pneg %p2179_p12 }
 0x8fc   : > { %p2185_p1 = pnand %p2183_p0, %p2180_p13 }
 0x8fe   : > { %2188 = shalt.err (!%p2185_p1)
}
 0x8ff   : > { %2091 = dma.vmem_to_hbm [thread:$0]  (%p2555_p3), %s1705_s18, 32, %s2607_s11, [#allocation9]  }
 0x900   : > { %2212 = dma.done.wait (%p2555_p3), [#allocation9], 32  }
 0x901   : > { %2214 = vsyncadd (%p2555_p3), [#allocation9], 4294967264 }
 0x902 PF: > { %s28_s25 = sadd.s32 1, %s2233_s25   ;;  %s2609_s22 = smov %s2221_s23 }
 0x903   : > { %p25_p2 = scmp.ge.s32.totalorder %s28_s25, 4   ;;  %s2610_s23 = smov %s2343_s30 }
 0x904   : > { %s2611_s24 = smov %s2229_s0  ;;  %s2612_s0 = smov %s2614_s27 }
 0x905   :  { %27 = sbr.rel (!%p25_p2) target bundleno = 18 (0x12), region = 142 }
 0x90c   :  { %1717 = vsyncpa [#allocation9], 1 }
 0x90d   :  { %1719 = vsyncpa [#allocation9 + $0x1], 1 }

</bundles_post_ra>
